<compile_context>
chip_gen: v6e
topology: v6e:2x2x1
jax: 0.10.0
libtpu: 0.0.40
codegen_flags: <defaults>
</compile_context>

<pallas_src>
import jax
import jax.numpy as jnp
from jax.experimental import pallas as pl
from jax.experimental.pallas import tpu as pltpu


def _round_up(x, m):
    return (x + m - 1) // m * m


def _vmem_capacity_bytes():
    try:
        return int(pltpu.get_tpu_info().vmem_capacity_bytes)
    except Exception:
        return 64 * 1024 * 1024  # conservative fallback (v7x per-core VMEM)


def _choose_tm(m, fits):
    """Pick a row tile: as large as the VMEM budget allows, but prefer >=2 row tiles
    (v7x megacore sharding + pipelining) and low row-padding waste."""
    m8 = _round_up(m, 8)
    best_key, best_t = None, 8
    for t in (1024, 512, 256, 128, 64, 32, 16, 8):
        if not fits(t):
            continue
        m_pad = _round_up(m8, t)
        n_tiles = m_pad // t
        waste = (m_pad - m8) / m_pad
        key = (0 if n_tiles >= 2 else 1, 0 if waste <= 0.125 else 1, -t)
        if best_key is None or key < best_key:
            best_key, best_t = key, t
    return best_t


# ----------------------------- kernels ---------------------------------------


def ffn_resident_kernel(x_ref, w1_ref, b1_ref, w2_ref, b2_ref, o_ref):
    # Weights fully VMEM-resident (constant index_map -> loaded once, reused for
    # every row tile).  No accumulator scratch needed.
    h = jnp.dot(x_ref[...], w1_ref[...], preferred_element_type=jnp.float32)
    h = jnp.maximum(h + b1_ref[...], 0.0)          # bias + ReLU in f32
    # dropout (eval mode) == identity
    o = jnp.dot(h.astype(w2_ref.dtype), w2_ref[...],
                preferred_element_type=jnp.float32)
    o_ref[...] = (o + b2_ref[...]).astype(o_ref.dtype)


def ffn_streamed_kernel(x_ref, w1_ref, b1_ref, w2_ref, b2_ref, o_ref, acc_ref):
    # dff ("hidden") dimension streamed in chunks of tk; the f32 accumulator stays
    # resident across the dff grid axis (output BlockSpec constant over k) and is
    # finalized (bias + cast + store) on the last step.
    k = pl.program_id(1)

    @pl.when(k == 0)
    def _():
        acc_ref[...] = jnp.zeros_like(acc_ref)

    h = jnp.dot(x_ref[...], w1_ref[...], preferred_element_type=jnp.float32)
    h = jnp.maximum(h + b1_ref[...], 0.0)          # bias + ReLU in f32
    # dropout (eval mode) == identity
    acc_ref[...] += jnp.dot(h.astype(w2_ref.dtype), w2_ref[...],
                            preferred_element_type=jnp.float32)

    @pl.when(k == pl.num_programs(1) - 1)
    def _():
        o_ref[...] = (acc_ref[...] + b2_ref[...]).astype(o_ref.dtype)


# ----------------------------- wrapper ----------------------------------------


def feed_forward_net(x, w1, b1, w2, b2, *, tm=None, tk=None,
                     compute_dtype=jnp.bfloat16, vmem_limit_bytes=None):
    """Fused FFN forward: out = ReLU(x @ W1 + b1) @ W2 + b2.

    x: [..., D]; w1: [D, DFF]; b1: [DFF]; w2: [DFF, D]; b2: [D]
    (weights stored [in, out] so the kernel does plain x @ W).

    compute_dtype: dtype of the matmul *operands*.  Defaults to bfloat16 -- the MXU
    on v5e, v6e and v7x is bf16-native; f32 operands run a slow multi-pass MXU path
    and double weight/activation HBM traffic.  Accumulation is always f32.
    """
    orig_shape = x.shape
    out_dtype = x.dtype
    d = orig_shape[-1]
    dff = w1.shape[1]
    assert w1.shape[0] == d and w2.shape == (dff, d)
    assert b1.shape == (dff,) and b2.shape == (d,)

    x2 = x.reshape(-1, d)
    m = x2.shape[0]
    cdt = jnp.dtype(compute_dtype if compute_dtype is not None else x.dtype)

    # Feature dims padded to lane width (128) so stores are lane-dense and the MXU
    # is fully fed.  Padding copies are skipped entirely when already aligned.
    d_pad = _round_up(d, 128)
    dff_pad = _round_up(dff, 128)

    # --- VMEM-budget-derived tiling (generation-aware: 128 MiB v5e/v6e, 64 MiB v7x) ---
    capacity = _vmem_capacity_bytes()
    if vmem_limit_bytes is None:
        vmem_limit_bytes = int(capacity * 0.75)   # ~96 MiB on v5e/v6e, ~48 MiB on v7x
    budget = int(vmem_limit_bytes * 0.85)         # headroom for compiler-internal scratch
    cdt_b = cdt.itemsize
    out_b = jnp.dtype(out_dtype).itemsize

    def streamed_footprint(tm_, tk_):
        return (2 * 2 * d_pad * tk_ * cdt_b            # W1 + W2 chunks (double-buffered)
                + 2 * tm_ * d_pad * (cdt_b + out_b)    # x + out row tiles (double-buffered)
                + tm_ * d_pad * 4                      # f32 accumulator scratch
                + tm_ * tk_ * (4 + cdt_b)              # h (f32) + cast temp
                + 2 * (tk_ + d_pad) * 4)               # b1 / b2

    def resident_footprint(tm_):
        return (2 * 2 * d_pad * dff_pad * cdt_b        # W1 + W2 fully resident
                + 2 * tm_ * d_pad * (cdt_b + out_b)    # x + out row tiles
                + tm_ * dff_pad * (4 + cdt_b)          # h (f32) + cast temp
                + 2 * (dff_pad + d_pad) * 4)           # b1 / b2

    if tm is None:
        tm = _choose_tm(m, lambda t: streamed_footprint(t, 128) <= budget)
    tm = max(8, _round_up(tm, 8))

    if tk is not None:
        assert dff_pad % tk == 0 and tk % 128 == 0
        resident = False
    elif resident_footprint(tm) <= budget:
        resident = True                                # weights loaded once, never re-streamed
    else:
        resident = False
        for cand in (dff_pad, 4096, 2048, 1024, 512, 256, 128):
            if cand <= dff_pad and dff_pad % cand == 0 and \
                    streamed_footprint(tm, cand) <= budget:
                tk = cand                              # largest dff chunk that fits
                break
        else:
            tk = 128
        while tm > 8 and streamed_footprint(tm, tk) > budget:
            tm = max(8, tm // 2)

    m_pad = _round_up(m, tm)

    # --- cast + zero-pad ONLY when needed (aligned shapes pass straight through) ---
    # Zero-padding keeps the math exact: padded inputs/hidden units contribute 0,
    # padded output columns/rows are sliced off.
    x_c = x2.astype(cdt)
    if (m_pad, d_pad) != (m, d):
        x_c = jnp.pad(x_c, ((0, m_pad - m), (0, d_pad - d)))
    w1_c = w1.astype(cdt)
    if (d_pad, dff_pad) != (d, dff):
        w1_c = jnp.pad(w1_c, ((0, d_pad - d), (0, dff_pad - dff)))
    w2_c = w2.astype(cdt)
    if (dff_pad, d_pad) != (dff, d):
        w2_c = jnp.pad(w2_c, ((0, dff_pad - dff), (0, d_pad - d)))
    b1_c = b1.astype(jnp.float32).reshape(1, dff)
    if dff_pad != dff:
        b1_c = jnp.pad(b1_c, ((0, 0), (0, dff_pad - dff)))
    b2_c = b2.astype(jnp.float32).reshape(1, d)
    if d_pad != d:
        b2_c = jnp.pad(b2_c, ((0, 0), (0, d_pad - d)))

    n_rows = m_pad // tm
    if resident:
        grid = (n_rows,)
        in_specs = [
            pl.BlockSpec((tm, d_pad),      lambda i: (i, 0)),   # x row tile
            pl.BlockSpec((d_pad, dff_pad), lambda i: (0, 0)),   # W1 (VMEM-resident)
            pl.BlockSpec((1, dff_pad),     lambda i: (0, 0)),   # b1 (resident)
            pl.BlockSpec((dff_pad, d_pad), lambda i: (0, 0)),   # W2 (VMEM-resident)
            pl.BlockSpec((1, d_pad),       lambda i: (0, 0)),   # b2 (resident)
        ]
        out_specs = pl.BlockSpec((tm, d_pad), lambda i: (i, 0))
        scratch_shapes = []
        kernel = ffn_resident_kernel
        dim_sem = ("parallel",)
    else:
        grid = (n_rows, dff_pad // tk)        # rows (parallel), dff reduction (arbitrary, last)
        in_specs = [
            pl.BlockSpec((tm, d_pad), lambda i, k: (i, 0)),     # x row tile
            pl.BlockSpec((d_pad, tk), lambda i, k: (0, k)),     # W1 dff chunk (streamed)
            pl.BlockSpec((1, tk),     lambda i, k: (0, k)),     # b1 dff chunk
            pl.BlockSpec((tk, d_pad), lambda i, k: (k, 0)),     # W2 dff chunk (streamed)
            pl.BlockSpec((1, d_pad),  lambda i, k: (0, 0)),     # b2 (resident)
        ]
        # constant across k -> output block stays resident over the dff reduction
        out_specs = pl.BlockSpec((tm, d_pad), lambda i, k: (i, 0))
        scratch_shapes = [pltpu.VMEM((tm, d_pad), jnp.float32)]
        kernel = ffn_streamed_kernel
        dim_sem = ("parallel", "arbitrary")

    out = pl.pallas_call(
        kernel,
        out_shape=jax.ShapeDtypeStruct((m_pad, d_pad), out_dtype),
        grid_spec=pltpu.PrefetchScalarGridSpec(
            num_scalar_prefetch=0,
            grid=grid,
            in_specs=in_specs,
            out_specs=out_specs,
            scratch_shapes=scratch_shapes,
        ),
        compiler_params=pltpu.CompilerParams(
            dimension_semantics=dim_sem,
            vmem_limit_bytes=vmem_limit_bytes,
        ),
    )(x_c, w1_c, b1_c, w2_c, b2_c)

    if (m_pad, d_pad) != (m, d):
        out = out[:m, :d]
    return out.reshape(orig_shape)


def init_params(key, dimension, dff, dtype=jnp.float32):
    """Deterministic init mimicking nn.Linear default (U[-1/sqrt(fan_in), +...])."""
    k1, k2, k3, k4 = jax.random.split(key, 4)
    bound1 = 1.0 / (dimension ** 0.5)
    bound2 = 1.0 / (dff ** 0.5)
    # stored already transposed: [in, out]
    w1 = jax.random.uniform(k1, (dimension, dff), dtype, -bound1, bound1)
    b1 = jax.random.uniform(k2, (dff,), dtype, -bound1, bound1)
    w2 = jax.random.uniform(k3, (dff, dimension), dtype, -bound2, bound2)
    b2 = jax.random.uniform(k4, (dimension,), dtype, -bound2, bound2)
    return w1, b1, w2, b2


def _ref_ffn(x, w1, b1, w2, b2):
    h = jnp.maximum(jnp.dot(x.reshape(-1, x.shape[-1]), w1, precision="highest") + b1, 0.0)
    return (jnp.dot(h, w2, precision="highest") + b2).reshape(x.shape)


if __name__ == "__main__":
    key = jax.random.PRNGKey(0)
    kx, kp, kx2, kp2 = jax.random.split(key, 4)

    # ---- small demo (resident-weights path, bf16 MXU operands by default) ----
    batch, seq, dimension, dff = 2, 8, 32, 64
    x = jax.random.normal(kx, (batch, seq, dimension), jnp.float32)
    w1, b1, w2, b2 = init_params(kp, dimension, dff)
    ref = _ref_ffn(x, w1, b1, w2, b2)

    y = jax.block_until_ready(feed_forward_net(x, w1, b1, w2, b2))
    assert y.shape == x.shape and y.dtype == x.dtype
    assert jnp.allclose(y, ref, atol=1e-1, rtol=5e-2)

    # ---- aligned shapes (no padding copies) + forced dff streaming, f32 operands ----
    batch2, seq2, dimension2, dff2 = 4, 64, 128, 512
    x2 = jax.random.normal(kx2, (batch2, seq2, dimension2), jnp.float32)
    w1b, b1b, w2b, b2b = init_params(kp2, dimension2, dff2)
    ref2 = _ref_ffn(x2, w1b, b1b, w2b, b2b)

    y2 = jax.block_until_ready(
        feed_forward_net(x2, w1b, b1b, w2b, b2b, compute_dtype=jnp.float32, tk=128))
    assert y2.shape == x2.shape
    assert jnp.allclose(y2, ref2, atol=5e-3, rtol=5e-3)

    print("KERNEL_OK")
</pallas_src>

<mosaic_0001>
module attributes {stable_mosaic.version = 11 : i64} {
  func.func @ffn_resident_kernel(%arg0: i32, %arg1: memref<8x128xbf16, #tpu.memory_space<vmem>>, %arg2: memref<128x128xbf16, #tpu.memory_space<vmem>>, %arg3: memref<1x128xf32, #tpu.memory_space<vmem>>, %arg4: memref<128x128xbf16, #tpu.memory_space<vmem>>, %arg5: memref<1x128xf32, #tpu.memory_space<vmem>>, %arg6: memref<8x128xf32, #tpu.memory_space<vmem>>) attributes {dimension_semantics = [#tpu.dimension_semantics<parallel>], iteration_bounds = array<i64: 2>, scalar_prefetch = 0 : i64, scratch_operands = 0 : i64, tpu.core_type = #tpu.core_type<tc>, window_params = [{transform_indices = @transform_0, window_bounds = array<i64: 8, 128>}, {pipeline_mode = #tpu.pipeline_mode<synchronous>, transform_indices = @transform_1, window_bounds = array<i64: 128, 128>}, {pipeline_mode = #tpu.pipeline_mode<synchronous>, transform_indices = @transform_2, window_bounds = array<i64: 1, 128>}, {pipeline_mode = #tpu.pipeline_mode<synchronous>, transform_indices = @transform_3, window_bounds = array<i64: 128, 128>}, {pipeline_mode = #tpu.pipeline_mode<synchronous>, transform_indices = @transform_4, window_bounds = array<i64: 1, 128>}, {transform_indices = @transform_5, window_bounds = array<i64: 8, 128>}]} {
    %c0 = arith.constant 0 : index
    %c0_0 = arith.constant 0 : index
    %0 = vector.load %arg1[%c0, %c0_0] : memref<8x128xbf16, #tpu.memory_space<vmem>>, vector<8x128xbf16>
    %c0_1 = arith.constant 0 : index
    %c0_2 = arith.constant 0 : index
    %1 = vector.load %arg2[%c0_1, %c0_2] : memref<128x128xbf16, #tpu.memory_space<vmem>>, vector<128x128xbf16>
    %cst = arith.constant dense<0.000000e+00> : vector<8x128xf32>
    %2 = tpu.matmul %0, %1, %cst {dimension_numbers = #tpu.dot_dimension_numbers<[1], [0], [0], [1], [0, 0, 1, 1], [], []>} : vector<8x128xbf16>, vector<128x128xbf16>, vector<8x128xf32> -> vector<8x128xf32>
    %c0_3 = arith.constant 0 : index
    %c0_4 = arith.constant 0 : index
    %3 = vector.load %arg3[%c0_3, %c0_4] : memref<1x128xf32, #tpu.memory_space<vmem>>, vector<1x128xf32>
    %4 = vector.broadcast %3 : vector<1x128xf32> to vector<8x128xf32>
    %5 = arith.addf %2, %4 : vector<8x128xf32>
    %cst_5 = arith.constant 0.000000e+00 : f32
    %6 = vector.broadcast %cst_5 : f32 to vector<8x128xf32>
    %7 = arith.maximumf %5, %6 : vector<8x128xf32>
    %8 = arith.truncf %7 : vector<8x128xf32> to vector<8x128xbf16>
    %c0_6 = arith.constant 0 : index
    %c0_7 = arith.constant 0 : index
    %9 = vector.load %arg4[%c0_6, %c0_7] : memref<128x128xbf16, #tpu.memory_space<vmem>>, vector<128x128xbf16>
    %cst_8 = arith.constant dense<0.000000e+00> : vector<8x128xf32>
    %10 = tpu.matmul %8, %9, %cst_8 {dimension_numbers = #tpu.dot_dimension_numbers<[1], [0], [0], [1], [0, 0, 1, 1], [], []>} : vector<8x128xbf16>, vector<128x128xbf16>, vector<8x128xf32> -> vector<8x128xf32>
    %c0_9 = arith.constant 0 : index
    %c0_10 = arith.constant 0 : index
    %11 = vector.load %arg5[%c0_9, %c0_10] : memref<1x128xf32, #tpu.memory_space<vmem>>, vector<1x128xf32>
    %12 = vector.broadcast %11 : vector<1x128xf32> to vector<8x128xf32>
    %13 = arith.addf %10, %12 : vector<8x128xf32>
    %c0_11 = arith.constant 0 : index
    %c0_12 = arith.constant 0 : index
    %14 = vector.load %arg6[%c0_11, %c0_12] : memref<8x128xf32, #tpu.memory_space<vmem>>, vector<8x128xf32>
    tpu.vector_store %arg6[%c0_11, %c0_12], %13 {strides = array<i32>} : memref<8x128xf32, #tpu.memory_space<vmem>>, vector<8x128xf32>,
    return
  }
  func.func @transform_0(%arg0: i32) -> (i32, i32) {
    %c0_i32 = arith.constant 0 : i32
    %c0_i32_0 = arith.constant 0 : i32
    return %arg0, %c0_i32 : i32, i32
  }
  func.func @transform_1(%arg0: i32) -> (i32, i32) {
    %c0_i32 = arith.constant 0 : i32
    %c0_i32_0 = arith.constant 0 : i32
    %c0_i32_1 = arith.constant 0 : i32
    return %c0_i32, %c0_i32_0 : i32, i32
  }
  func.func @transform_2(%arg0: i32) -> (i32, i32) {
    %c0_i32 = arith.constant 0 : i32
    %c0_i32_0 = arith.constant 0 : i32
    %c0_i32_1 = arith.constant 0 : i32
    return %c0_i32, %c0_i32_0 : i32, i32
  }
  func.func @transform_3(%arg0: i32) -> (i32, i32) {
    %c0_i32 = arith.constant 0 : i32
    %c0_i32_0 = arith.constant 0 : i32
    %c0_i32_1 = arith.constant 0 : i32
    return %c0_i32, %c0_i32_0 : i32, i32
  }
  func.func @transform_4(%arg0: i32) -> (i32, i32) {
    %c0_i32 = arith.constant 0 : i32
    %c0_i32_0 = arith.constant 0 : i32
    %c0_i32_1 = arith.constant 0 : i32
    return %c0_i32, %c0_i32_0 : i32, i32
  }
  func.func @transform_5(%arg0: i32) -> (i32, i32) {
    %c0_i32 = arith.constant 0 : i32
    %c0_i32_0 = arith.constant 0 : i32
    return %arg0, %c0_i32 : i32, i32
  }
}

</mosaic_0001>

<bundles_post_ra>
// kernel: tpu_custom_call.1
= control target key start
LH: loop header
LB: loop body
LE: loop exit
PB: predicated region body
PF: predicated region fallthrough
CT: control target
= control target key end

     0   :  { %10 = vsyncpa [#allocation3], 0  ;;  %s1153_s0 = inlined_call_operand.hbm [shape: bf16[16,128], index: 0, kind: input, shape index: {}]   ;;  %s1154_s1 = inlined_call_operand.hbm [shape: bf16[128,128], index: 1, kind: input, shape index: {}]   ;;  %s1155_s2 = inlined_call_operand.vmem [shape: f32[1,128], index: 2, kind: input, shape index: {}]   ;;  %s1156_s3 = inlined_call_operand.hbm [shape: bf16[128,128], index: 3, kind: input, shape index: {}]   ;;  %s1157_s4 = inlined_call_operand.vmem [shape: f32[1,128], index: 4, kind: input, shape index: {}]   ;;  %s1158_s5 = inlined_call_operand.hbm [shape: f32[16,128], index: 5, kind: output, shape index: {}]  }
   0x1   :  { %12 = vsyncpa [#allocation3 + $0x1], 0 }
   0x2   :  { %13 = vsyncpa [#allocation6], 0 }
   0x3   :  { %14 = vsyncpa [#allocation4], 0 }
   0x4   :  { %16 = vsyncpa [#allocation4 + $0x1], 0  ;;  %s966_s18 = smov 0   ;;  %s968_s19 = smov 0  }
   0x5   :  { %s970_s20 = smov 0   ;;  %s972_s21 = smov 0  }
   0x6 LB: > { %s987_s22 = sadd.s32 4294967295, %s926_s21   ;;  %s599_s23 = sadd.s32 4294967294, %s926_s21   ;;  %s926_s21 = sphi %s972_s21, %s1180_s21   ;;  %s922_s20 = sphi %s970_s20, %s1179_s20   ;;  %s918_s19 = sphi %s968_s19, %s1178_s19   ;;  %s914_s18 = sphi %s966_s18, %s1177_s18  }
   0x7   : > { %p42_p0 = scmp.ne.s32.totalorder %s918_s19, %s914_s18  ;;  %p1159_p1 = scmp.eq.s32.totalorder %s987_s22, 0 }
   0x8   : > { %p156_p3 = scmp.eq.s32.totalorder %s599_s23, 1  ;;  %p600_p5 = scmp.ge.s32.totalorder %s926_s21, 1 }
   0x9   : > { %p996_p4 = por %p1159_p1, %p42_p0  ;;  %p163_p7 = scmp.lt.s32.totalorder %s926_s21, 3 }
   0xa   : > { %p1001_p6 = por %p156_p3, %p42_p0  ;;  %s928_s27 = smov [#allocation5]  }
   0xb   : > { %s1163_s24 = scalar_select %p996_p4, 1, 0 }
   0xc   : > { %s1164_s25 = scalar_select %p1001_p6, 1, 0 }
   0xd   : > { %p1006_p8 = pnand %p600_p5, %p163_p7  ;;  %s175_s28 = sshll.u32 %s928_s27, 4  ;;  %s176_s28 = int_to_ptr.vmem [resolvable:$true] %s175_s28 }
   0xe   : > { %s929_s30 = smov [#allocation7]   ;;  %s789_s7 = scalar_lea.vmem %s176_s28, 1024 }
   0xf   : > { %s1165_s26 = scalar_select %p1006_p8, 1, 0 }
  0x10   : > { %p703_p9 = pneg %p1006_p8  ;;  %s191_s6 = sshll.u32 %s929_s30, 4  ;;  %s192_s6 = int_to_ptr.vmem [resolvable:$true] %s191_s6 }
  0x11   : > { %p790_p13 = scmp.ne.s32.totalorder %s176_s28, %s789_s7  ;;  %p797_p5 = scmp.lt.s32.totalorder %s176_s28, %s176_s28 }
  0x12   : > { %p1015_p11 = pnand %p703_p9, %p1159_p1  ;;  %p798_p7 = scmp.lt.s32.totalorder %s789_s7, %s789_s7 }
  0x14   : > { %p780_p12 = pneg %p1015_p11  ;;  %p799_p10 = por %p798_p7, %p797_p5 }
  0x16   : > { %p792_p0 = pnand %p790_p13, %p780_p12 }
  0x18   : > { %p793_p3 = pneg %p792_p0 }
  0x1a   : > { %p800_p9 = pnand %p799_p10, %p793_p3 }
  0x1c   : > { %803 = shalt.err (!%p800_p9)
}
  0x1d   : > { %s930_s8 = smov 64   ;;  %s931_s9 = smov 4  }
  0x1e   : > { %706 = dma.hbm_to_vmem [thread:$0]  (!%p1015_p11), %s1154_s1, 1024, %s176_s28, [#allocation6], %s930_s8, %s930_s8, %s931_s9  }
  0x1f   : > { %s815_s12 = scalar_lea.vmem %s192_s6, 1024  ;;  %p823_p2 = scmp.lt.s32.totalorder %s192_s6, %s192_s6 }
  0x20   : > { %p816_p1 = scmp.ne.s32.totalorder %s192_s6, %s815_s12  ;;  %p824_p6 = scmp.lt.s32.totalorder %s815_s12, %s815_s12 }
  0x22   : > { %p818_p13 = pnand %p816_p1, %p780_p12  ;;  %p825_p5 = por %p824_p6, %p823_p2 }
  0x24   : > { %p819_p0 = pneg %p818_p13 }
  0x26   : > { %p826_p10 = pnand %p825_p5, %p819_p0 }
  0x28   : > { %829 = shalt.err (!%p826_p10)
}
  0x29   : > { %709 = dma.hbm_to_vmem [thread:$0]  (!%p1015_p11), %s1156_s3, 1024, %s192_s6, [#allocation6], %s930_s8, %s930_s8, %s931_s9  }
  0x2a   : > { %s1038_s15 = sadd.s32 1, %s926_s21   ;;  %s29_s16 = sadd.s32 1, %s922_s20 }
  0x2b   : > { %s26_s17 = ssub.s32 %s926_s21, %s1038_s15  ;;  %p36_p1 = scmp.ne.s32.totalorder %s922_s20, %s918_s19 }
  0x2c   : > { %p27_p2 = scmp.eq.s32.totalorder %s26_s17, 0  ;;  %p37_p6 = scmp.eq.s32.totalorder %s926_s21, 0 }
  0x2d   : > { %p1167_p12 = scmp.eq.s32.totalorder %s987_s22, 1  ;;  %p720_p7 = scmp.lt.s32.totalorder %s926_s21, 2 }
  0x2e   : > { %s1054_s27 = scalar_select %p27_p2, %s922_s20, %s29_s16  }
  0x2f   : > { %p1048_p3 = por %p1167_p12, %p36_p1  ;;  %p38_p9 = por %p37_p6, %p36_p1 }
  0x30   : > { %s208_s28 = sand.u32 1, %s922_s20   ;;  %s605_s30 = sshll.u32 %s926_s21, 6 }
  0x31   : > { %s1168_s23 = scalar_select %p1048_p3, 1, 0 }
  0x32   : > { %s604_s29 = sshll.u32 %s208_s28, 2  ;;  %s1061_s8 = scalar_lea.hbm %s1153_s0, %s605_s30 }
  0x33   : > { %s212_s9 = scalar_lea.vmem [#allocation2], %s604_s29  ;;  %p1063_p11 = pnand %p720_p7, %p38_p9 }
  0x34   : > { %s219_s10 = sshll.u32 %s212_s9, 4  ;;  %s209_s12 = scalar_lea.sflag [#allocation3], %s208_s28  ;;  %s220_s10 = int_to_ptr.vmem [resolvable:$true] %s219_s10 }
  0x35   : > { %s830_s13 = scalar_lea.hbm %s1061_s8, 64  ;;  %p832_p0 = pneg %p1063_p11 }
  0x36   : > { %p831_p13 = scmp.ne.s32.totalorder %s1061_s8, %s830_s13  ;;  %s835_s17 = scalar_lea.hbm %s1153_s0, 128 }
  0x37   : > { %p836_p1 = scmp.lt.s32.totalorder %s1061_s8, %s1153_s0  ;;  %p837_p2 = scmp.lt.s32.totalorder %s835_s17, %s830_s13 }
  0x38   : > { %p833_p5 = pnand %p832_p0, %p831_p13 }
  0x39   : > { %p838_p6 = por %p837_p2, %p836_p1 }
  0x3a   : > { %p834_p10 = pneg %p833_p5 }
  0x3c   : > { %p839_p12 = pnand %p838_p6, %p834_p10 }
  0x3e   : > { %842 = shalt.err (!%p839_p12)
}
  0x3f   : > { %s843_s6 = scalar_lea.vmem %s220_s10, 64  ;;  %s932_s28 = smov [#allocation2]  }
  0x40   : > { %p844_p7 = scmp.ne.s32.totalorder %s220_s10, %s843_s6  ;;  %s848_s7 = sshll.u32 %s932_s28, 4  ;;  %s849_s7 = int_to_ptr.vmem [resolvable:$false] %s848_s7 }
  0x41   : > { %s850_s9 = scalar_lea.vmem %s849_s7, 128  ;;  %p851_p13 = scmp.lt.s32.totalorder %s220_s10, %s849_s7 }
  0x42   : > { %p846_p9 = pnand %p844_p7, %p832_p0  ;;  %p852_p5 = scmp.lt.s32.totalorder %s850_s9, %s843_s6 }
  0x44   : > { %p847_p3 = pneg %p846_p9  ;;  %p853_p4 = por %p852_p5, %p851_p13 }
  0x46   : > { %p854_p8 = pnand %p853_p4, %p847_p3 }
  0x48   : > { %857 = shalt.err (!%p854_p8)
}
  0x49   : > { %713 = dma.hbm_to_vmem [thread:$0]  (!%p1063_p11), %s1061_s8, 64, %s220_s10, %s209_s12  }
  0x4a   : > { %p1170_p10 = scmp.ne.s32.totalorder %s1165_s26, 0 }
  0x4b   : > { %s1084_s13 = sand.u32 (!%p1170_p10), 1, %s918_s19   ;;  %p1171_p0 = scmp.ne.s32.totalorder (!%p1170_p10), %s1163_s24, 0 }
  0x4c   : > { %228 = sbr.rel (%p1170_p10) target bundleno = 527 (0x20f), region = 40  ;;  %s607_s14 = sshll.u32 (!%p1170_p10), %s1084_s13, 2 }
  0x4d   : > { %s231_s16 = scalar_lea.sflag (!%p1170_p10), [#allocation3], %s1084_s13  ;;  %s1088_s17 = scalar_lea.vmem (!%p1170_p10), [#allocation2], %s607_s14 }
  0x51   : > { %901 = dma.done.wait (%p1171_p0), %s231_s16, 64  }
  0x52   : > { %903 = vsyncadd (%p1171_p0), %s231_s16, 4294967232  ;;  %p1172_p4 = scmp.eq.s32.totalorder %s987_s22, 0 }
  0x54   : > { %905 = dma.done.wait (%p1172_p4), [#allocation6], 2048   ;;  %p1173_p8 = pmov %p1172_p4 }
  0x55   : > { %v933_v0 = vmov 0.0   ;;  %vm934_vm0 = vmmov 0   ;;  %v762_v1 = vld [vmem:[#allocation5 + $0x38] sm:$0xff]   ;;  %v763_v2 = vld [vmem:[#allocation5 + $0x30] sm:$0xff]   ;;  %v764_v3 = vld [vmem:[#allocation5 + $0x28] sm:$0xff]   ;;  %s610_s8 = sshll.u32 %s1084_s13, 3 }
  0x56   : > { %907 = vsyncadd (%p1173_p8), [#allocation6], 4294965248  ;;  %651 = vmatprep.subr.bf16.mxu0 %v933_v0  ;;  %667 = vmatprep.mubr.msk.bf16.mxu0 %vm934_vm0, %v933_v0  ;;  %v770_v4 = vld [vmem:[#allocation7 + $0x38] sm:$0xff]   ;;  %v765_v5 = vld [vmem:[#allocation5 + $0x20] sm:$0xff]   ;;  %s630_s12 = sshll.u32 %s987_s22, 7  ;;  %s268_s30 = scalar_lea.vmem [#allocation8], %s610_s8 }
  0x57   : > { %671 = vmatprep.subr.bf16.mxu1 %v933_v0  ;;  %687 = vmatprep.mubr.msk.bf16.mxu1 %vm934_vm0, %v933_v0  ;;  %v771_v6 = vld [vmem:[#allocation7 + $0x30] sm:$0xff]   ;;  %v766_v7 = vld [vmem:[#allocation5 + $0x18] sm:$0xff]   ;;  %v772_v8 = vld [vmem:[#allocation7 + $0x28] sm:$0xff]   ;;  %s510_s29 = sshll.u32 %s268_s30, 4  ;;  %s1110_s7 = scalar_lea.hbm %s1158_s5, %s630_s12  ;;  %s1112_s29 = int_to_ptr.vmem [resolvable:$true] %s510_s29 }
  0x58   : > { %652 = vmatpush3.bf16.msra.mxu0 %v762_v1  ;;  %672 = vmatpush3.bf16.msra.mxu1 %v770_v4  ;;  %v767_v9 = vld [vmem:[#allocation5 + $0x10] sm:$0xff]   ;;  %v773_v10 = vld [vmem:[#allocation7 + $0x20] sm:$0xff]   ;;  %v768_v11 = vld [vmem:[#allocation5 + $0x8] sm:$0xff]   ;;  %s497_s9 = scalar_lea.sflag [#allocation4], %s1084_s13  ;;  %s858_s14 = scalar_lea.vmem %s1112_s29, 128 }
  0x59   : > { %653 = vmatprep.subr.bf16.mxu0 %v933_v0  ;;  %673 = vmatprep.subr.bf16.mxu1 %v933_v0  ;;  %v774_v12 = vld [vmem:[#allocation7 + $0x18] sm:$0xff]   ;;  %v769_v13 = vld [vmem:[#allocation5] sm:$0xff]   ;;  %v775_v14 = vld [vmem:[#allocation7 + $0x10] sm:$0xff]   ;;  %p859_p3 = scmp.ne.s32.totalorder %s1112_s29, %s858_s14  ;;  %p1174_p11 = scmp.ne.s32.totalorder %s1168_s23, 0 }
  0x5a   : > { %v270_v15 = vld [vmem:[%s1088_s17] sm:$0xf]  ;;  %v776_v16 = vld [vmem:[#allocation7 + $0x8] sm:$0xff]   ;;  %v777_v17 = vld [vmem:[#allocation7] sm:$0xff]   ;;  %s935_s22 = smov [#allocation8]  }
  0x5b   : > { %v611_v18 = vld [vmem:[%s1155_s2] ss:$0 sm:$0xff]  ;;  %p860_p1 = pnand %p859_p3, %p1174_p11  ;;  %s862_s16 = sshll.u32 %s935_s22, 4  ;;  %s863_s16 = int_to_ptr.vmem [resolvable:$false] %s862_s16 }
  0x5c   : > { %654 = vmatpush3.bf16.msra.mxu0 %v763_v2  ;;  %674 = vmatpush3.bf16.msra.mxu1 %v771_v6  ;;  %v620_v26 = vld [vmem:[%s1157_s4] ss:$0 sm:$0xff]  ;;  %s864_s17 = scalar_lea.vmem %s863_s16, 256  ;;  %p865_p6 = scmp.lt.s32.totalorder %s1112_s29, %s863_s16 }
  0x5d   : > { %655 = vmatprep.subr.bf16.mxu0 %v933_v0  ;;  %675 = vmatprep.subr.bf16.mxu1 %v933_v0  ;;  %p861_p2 = pneg %p860_p1  ;;  %p866_p12 = scmp.lt.s32.totalorder %s864_s17, %s858_s14 }
  0x5f   : > { %p867_p7 = por %p866_p12, %p865_p6 }
  0x60   : > { %656 = vmatpush3.bf16.msra.mxu0 %v764_v3  ;;  %676 = vmatpush3.bf16.msra.mxu1 %v772_v8 }
  0x61   : > { %657 = vmatprep.subr.bf16.mxu0 %v933_v0  ;;  %677 = vmatprep.subr.bf16.mxu1 %v933_v0  ;;  %p868_p9 = pnand %p867_p7, %p861_p2 }
  0x64   : > { %658 = vmatpush3.bf16.msra.mxu0 %v765_v5  ;;  %678 = vmatpush3.bf16.msra.mxu1 %v773_v10 }
  0x65   : > { %659 = vmatprep.subr.bf16.mxu0 %v933_v0  ;;  %679 = vmatprep.subr.bf16.mxu1 %v933_v0 }
  0x68   : > { %660 = vmatpush3.bf16.msra.mxu0 %v766_v7  ;;  %680 = vmatpush3.bf16.msra.mxu1 %v774_v12 }
  0x69   : > { %661 = vmatprep.subr.bf16.mxu0 %v933_v0  ;;  %681 = vmatprep.subr.bf16.mxu1 %v933_v0 }
  0x6c   : > { %662 = vmatpush3.bf16.msra.mxu0 %v767_v9  ;;  %682 = vmatpush3.bf16.msra.mxu1 %v775_v14 }
  0x6d   : > { %663 = vmatprep.subr.bf16.mxu0 %v933_v0  ;;  %683 = vmatprep.subr.bf16.mxu1 %v933_v0 }
  0x70   : > { %664 = vmatpush3.bf16.msra.mxu0 %v768_v11  ;;  %684 = vmatpush3.bf16.msra.mxu1 %v776_v16 }
  0x71   : > { %665 = vmatprep.subr.bf16.mxu0 %v933_v0  ;;  %685 = vmatprep.subr.bf16.mxu1 %v933_v0 }
  0x74   : > { %666 = vmatpush3.bf16.msra.mxu0 %v769_v13  ;;  %686 = vmatpush3.bf16.msra.mxu1 %v777_v17 }
  0x77   : > { %668 = vmatmul.mubr.bf16.vlgmr.msra.gmra.mxu0 %v270_v15 }
 0x137   : > { %v376_v19 = vpop.f32.mrf.mxu0 }
 0x138   : > { %v377_v20 = vadd.f32 %v611_v18, %v376_v19 }
 0x139   : > { %v669_v21 = vpop.f32.mrf.mxu0 }
 0x13a   : > { %v382_v22 = vmax.f32 %v377_v20, 0.0 }
 0x13b   : > { %v379_v23 = vpop.f32.mrf.mxu0 }
 0x13c   : > { %v383_v24 = vpack.c.bf16 %v382_v22, %v382_v22 }
 0x13d   : > { %v670_v25 = vpop.f32.mrf.mxu0 }
 0x13e   : > { %688 = vmatmul.mubr.bf16.vlgmr.msra.gmra.mxu1 %v383_v24 }
 0x1fe   : > { %v489_v27 = vpop.f32.mrf.mxu1 }
 0x1ff   : > { %v490_v28 = vadd.f32 %v620_v26, %v489_v27 }
 0x200   : > { %v689_v29 = vpop.f32.mrf.mxu1 }
 0x201   : > { %495 = vst [vmem:[%s268_s30] sm:$0xff] %v490_v28 }
 0x202   : > { %v492_v30 = vpop.f32.mrf.mxu1 }
 0x203   : > { %871 = shalt.err (!%p868_p9)
}
 0x204   : > { %s872_s24 = scalar_lea.hbm %s1110_s7, 128  ;;  %s876_s8 = scalar_lea.hbm %s1158_s5, 256 }
 0x205   : > { %p873_p13 = scmp.ne.s32.totalorder %s1110_s7, %s872_s24  ;;  %p877_p0 = scmp.lt.s32.totalorder %s1110_s7, %s1158_s5 }
 0x206   : > { %p878_p4 = scmp.lt.s32.totalorder %s876_s8, %s872_s24 }
 0x207   : > { %p874_p5 = pnand %p873_p13, %p1174_p11 }
 0x208   : > { %p879_p8 = por %p878_p4, %p877_p0 }
 0x209   : > { %p875_p10 = pneg %p874_p5 }
 0x20b   : > { %p880_p3 = pnand %p879_p8, %p875_p10 }
 0x20d   : > { %883 = shalt.err (!%p880_p3)
}
 0x20e   : > { %701 = dma.vmem_to_hbm [thread:$0]  (%p1174_p11), %s1112_s29, 128, %s1110_s7, %s497_s9   ;;  %v690_v31 = vpop.f32.mrf.mxu1 }
 0x20f PF: > { %s522_s12 = sand.u32 1, %s914_s18   ;;  %p1175_p1 = scmp.ne.s32.totalorder %s1164_s25, 0 }
 0x210   : > { %p1176_p2 = scmp.ge.s32.totalorder %s926_s21, 2  ;;  %s523_s30 = scalar_lea.sflag [#allocation4], %s522_s12 }
 0x212   : > { %p715_p6 = pnand %p1176_p2, %p1175_p1 }
 0x214   : > { %p716_p12 = pneg %p715_p6 }
 0x216   : > { %909 = dma.done.wait (%p716_p12), %s523_s30, 128  }
 0x217   : > { %911 = vsyncadd (%p716_p12), %s523_s30, 4294967168  ;;  %p19_p7 = scmp.ge.s32.totalorder %s1038_s15, 4   ;;  %s1177_s18 = smov %s918_s19 }
 0x218   : > { %s1178_s19 = smov %s922_s20  ;;  %s1179_s20 = smov %s1054_s27 }
 0x219   : > { %s1180_s21 = smov %s1038_s15  ;;  %21 = sbr.rel (!%p19_p7) target bundleno = 6 (0x6), region = 93 }
 0x21e   :  { %528 = vsyncpa [#allocation3], 1 }
 0x21f   :  { %530 = vsyncpa [#allocation3 + $0x1], 1 }
 0x220   :  { %531 = vsyncpa [#allocation6], 1 }
 0x221   :  { %532 = vsyncpa [#allocation4], 1 }
 0x222   :  { %534 = vsyncpa [#allocation4 + $0x1], 1 }

</bundles_post_ra>
